<compile_context>
chip_gen: v7x
topology: tpu7x:2x2x1
jax: 0.10.0
libtpu: 0.0.40
codegen_flags: <defaults>
</compile_context>

<pallas_src>
import functools

import jax
import jax.numpy as jnp
from jax.experimental import pallas as pl
from jax.experimental.pallas import tpu as pltpu

_LANE = 128


def _cdiv(a, b):
    return -(-a // b)


def _vmem_capacity_bytes():
    """Trace-time VMEM capacity with a generation-aware fallback."""
    try:
        info = pltpu.get_tpu_info()
        for name in ("vmem_capacity_bytes", "vmem_size_bytes", "vmem_bytes"):
            v = getattr(info, name, None)
            if v:
                return int(v)
    except Exception:
        pass
    try:
        kind = jax.devices()[0].device_kind.lower()
        if any(tag in kind for tag in ("v4", "v5", "v6")):
            return 128 << 20          # v4 / v5e / v6e: 128 MiB per TensorCore
    except Exception:
        pass
    return 64 << 20                    # v7x (and unknown): be conservative


# ----------------------------------------------------------------------------
# Single-pass fused kernel: pool -> MLP -> sigmoid -> rescale.
# Block = (bb, C, HW): full spatial extent, so no padding garbage is visible
# and no masking is needed (Mosaic reductions respect the logical lane extent).
# ----------------------------------------------------------------------------
def _ca_fused_kernel(hw, x_ref, w1_ref, b1_ref, w2_ref, b2_ref, o_ref):
    x = x_ref[...]                                     # one load, native dtype
    s = jnp.sum(x, axis=-1, dtype=jnp.float32)         # (bb, C) f32
    mx = jnp.max(x, axis=-1).astype(jnp.float32)       # (bb, C) f32
    avg = s * (1.0 / hw)

    w1 = w1_ref[...]
    b1 = b1_ref[...]
    w2 = w2_ref[...]
    b2 = b2_ref[...]

    def mlp(p):                                        # p: (bb, C) f32
        z = jnp.dot(p, w1, preferred_element_type=jnp.float32) + b1
        z = jnp.maximum(z, 0.0)
        return jnp.dot(z, w2, preferred_element_type=jnp.float32) + b2

    scale = jax.nn.sigmoid(mlp(avg) + mlp(mx))         # (bb, C) f32
    o_ref[...] = (x * scale.astype(x.dtype)[:, :, None]).astype(o_ref.dtype)


# ----------------------------------------------------------------------------
# Two-pass fallback.
# Pass 1: spatially tiled sum/max reduction into per-(batch, chunk) partials.
#         Masking (sum AND max — OOB lanes are garbage, not zeros) only runs on
#         tiles at/after the boundary, built from a (1,1,tile) iota.
# Pass 2: combines chunk partials, runs the tiny MLP+sigmoid, rescales x.
# ----------------------------------------------------------------------------
def _pool_kernel(hw, tile, n_t, needs_mask, x_ref, psum_ref, pmax_ref):
    c = pl.program_id(1)
    t = pl.program_id(2)
    x = x_ref[...]                                     # (1, C, tile)

    def accum(s, m):
        s = s.reshape(psum_ref.shape)
        m = m.reshape(pmax_ref.shape)

        @pl.when(t == 0)
        def _():
            psum_ref[...] = s
            pmax_ref[...] = m

        @pl.when(t > 0)
        def _():
            psum_ref[...] = psum_ref[...] + s
            pmax_ref[...] = jnp.maximum(pmax_ref[...], m)

    def plain():
        accum(jnp.sum(x, axis=-1, keepdims=True, dtype=jnp.float32),
              jnp.max(x, axis=-1, keepdims=True).astype(jnp.float32))

    if not needs_mask:
        plain()
    else:
        g = c * n_t + t                                # global spatial tile index
        n_full = hw // tile                            # tiles with no padding

        @pl.when(g < n_full)
        def _():
            plain()

        @pl.when(g >= n_full)
        def _():
            # Only the boundary tile (and any fully-OOB tile) pays for masking.
            valid = hw - g * tile                      # may be <= 0 (fully OOB)
            lane = jax.lax.broadcasted_iota(jnp.int32, (1, 1, tile), 2)
            keep = lane < valid
            xf = x.astype(jnp.float32)
            accum(jnp.sum(jnp.where(keep, xf, 0.0), axis=-1, keepdims=True),
                  jnp.max(jnp.where(keep, xf, -jnp.inf), axis=-1, keepdims=True))


def _scale_kernel(hw, x_ref, psum_ref, pmax_ref, w1_ref, b1_ref, w2_ref, b2_ref,
                  o_ref):
    x = x_ref[...]                                     # (1, C, tile) native dtype
    tot = jnp.sum(psum_ref[...], axis=1)               # (1, C, 1) f32
    mxp = jnp.max(pmax_ref[...], axis=1)               # (1, C, 1) f32
    avg = tot[..., 0] * (1.0 / hw)                     # (1, C)
    mx = mxp[..., 0]                                   # (1, C)

    w1 = w1_ref[...]
    b1 = b1_ref[...]
    w2 = w2_ref[...]
    b2 = b2_ref[...]

    def mlp(p):                                        # p: (1, C) f32
        z = jnp.dot(p, w1, preferred_element_type=jnp.float32) + b1
        z = jnp.maximum(z, 0.0)
        return jnp.dot(z, w2, preferred_element_type=jnp.float32) + b2

    scale = jax.nn.sigmoid(mlp(avg) + mlp(mx))         # (1, C)
    o_ref[...] = (x * scale.astype(x.dtype)[:, :, None]).astype(o_ref.dtype)


# ----------------------------------------------------------------------------
# Wrapper
# ----------------------------------------------------------------------------
def channel_attention(x, w1, b1, bn_gamma, bn_beta, bn_mean, bn_var, w2, b2,
                      eps=1e-5, *, force_two_pass=False, force_tile=None,
                      max_batch_block=None, donate_x=False):
    """x: (B, C, H, W) -> (B, C, H, W). BatchNorm applied in eval mode."""
    B, C, H, W = x.shape
    Ch = w1.shape[0]
    HW = H * W
    itemsize = jnp.dtype(x.dtype).itemsize

    # ---- fold eval-mode BatchNorm2d into the first 1x1 conv (host side) ----
    inv_std = 1.0 / jnp.sqrt(bn_var.astype(jnp.float32) + eps)
    bns = bn_gamma.astype(jnp.float32) * inv_std                  # (Ch,)
    bnb = bn_beta.astype(jnp.float32) - bn_mean.astype(jnp.float32) * bns
    w1t = (w1.astype(jnp.float32) * bns[:, None]).T               # (C, Ch)
    b1r = (b1.astype(jnp.float32) * bns + bnb).reshape(1, Ch)
    w2t = w2.astype(jnp.float32).T                                # (Ch, C)
    b2r = b2.astype(jnp.float32).reshape(1, C)

    x_flat = x.reshape(B, C, HW)                # no host-side pad / copies

    # ---- VMEM budgeting ----
    vmem_cap = _vmem_capacity_bytes()
    budget = int(vmem_cap * 0.75)
    per_b = C * HW * itemsize                   # one VMEM copy of one batch row
    upcast_b = C * HW * 4 if itemsize < 4 else 0   # f32 temp for sum upcast (bf16)
    weight_bytes = 2 * 4 * (2 * C * Ch + C + Ch)   # double-buffered f32 weights

    def fused_footprint(bb, nbuf):
        return nbuf * 2 * bb * per_b + bb * upcast_b + weight_bytes

    nbuf = None
    if not force_two_pass:
        if fused_footprint(1, 2) <= budget:
            nbuf = 2
        elif fused_footprint(1, 1) <= budget:
            nbuf = 1                            # single-buffered retry (v7x big blocks)

    if nbuf is not None:
        # ---------------- fused single-pass path ----------------
        if nbuf == 2:
            bb_target = max(1, (8 << 20) // max(per_b, 1))        # ~8 MiB blocks
            bb_vmem = max(1, (budget - weight_bytes) // (4 * per_b + upcast_b))
            bb = max(1, min(B, bb_target, bb_vmem))
            if max_batch_block is not None:
                bb = max(1, min(bb, int(max_batch_block)))
            if B >= 4:                          # keep >= ~4 grid steps for overlap
                bb = min(bb, _cdiv(B, 4))
        else:
            bb = 1
        grid_b = _cdiv(B, bb)
        footprint = fused_footprint(bb, nbuf)
        vmem_limit = int(min(max(footprint + (8 << 20), 32 << 20),
                             vmem_cap * 0.9))

        def xspec(index_map):
            if nbuf == 2:
                return pl.BlockSpec((bb, C, HW), index_map)
            return pl.BlockSpec((bb, C, HW), index_map,
                                pipeline_mode=pl.Buffered(1))

        out_flat = pl.pallas_call(
            functools.partial(_ca_fused_kernel, HW),
            out_shape=jax.ShapeDtypeStruct((B, C, HW), x.dtype),
            grid_spec=pltpu.PrefetchScalarGridSpec(
                num_scalar_prefetch=0,
                grid=(grid_b,),
                in_specs=[
                    xspec(lambda b: (b, 0, 0)),                   # x block
                    pl.BlockSpec((C, Ch), lambda b: (0, 0)),      # w1 (BN folded)
                    pl.BlockSpec((1, Ch), lambda b: (0, 0)),      # b1 (BN folded)
                    pl.BlockSpec((Ch, C), lambda b: (0, 0)),      # w2
                    pl.BlockSpec((1, C), lambda b: (0, 0)),       # b2
                ],
                out_specs=xspec(lambda b: (b, 0, 0)),
            ),
            compiler_params=pltpu.CompilerParams(
                dimension_semantics=("parallel",),
                vmem_limit_bytes=vmem_limit),
            input_output_aliases=({0: 0} if donate_x else {}),
        )(x_flat, w1t, b1r, w2t, b2r)
    else:
        # ---------------- two-pass fallback ----------------
        hw_al = max(_LANE, (HW // _LANE) * _LANE)
        tile_budget = max(_LANE, ((budget // (4 * C * itemsize)) // _LANE) * _LANE)
        tile_target = max(_LANE, (((8 << 20) // (C * itemsize)) // _LANE) * _LANE)
        tile = min(tile_budget, tile_target, hw_al)
        if force_tile is not None:
            tile = int(force_tile)
        n_total = _cdiv(HW, tile)

        # Parallel spatial chunks so B * n_chunks >= ~4 (feeds both v7x cores
        # even for batch-1/2 inference).
        n_chunks = min(n_total, max(1, _cdiv(4, B)))
        n_t = _cdiv(n_total, n_chunks)
        n_chunks = _cdiv(n_total, n_t)          # no fully-empty chunks
        needs_mask = (n_chunks * n_t * tile != HW)

        if n_chunks * n_t == n_total:
            x_pool_map = lambda b, c, t: (b, 0, c * n_t + t)
        else:
            # Tiles past the end re-read the last real tile; kernel masks them
            # to the reduction's neutral element.
            x_pool_map = lambda b, c, t: (b, 0, jnp.minimum(c * n_t + t,
                                                            n_total - 1))

        vmem_limit = int(min(max(4 * C * tile * itemsize + C * tile * 4
                                 + weight_bytes + (8 << 20), 32 << 20),
                             vmem_cap * 0.9))

        psum, pmax = pl.pallas_call(
            functools.partial(_pool_kernel, HW, tile, n_t, needs_mask),
            out_shape=(jax.ShapeDtypeStruct((B, n_chunks, C, 1), jnp.float32),
                       jax.ShapeDtypeStruct((B, n_chunks, C, 1), jnp.float32)),
            grid_spec=pltpu.PrefetchScalarGridSpec(
                num_scalar_prefetch=0,
                grid=(B, n_chunks, n_t),
                in_specs=[pl.BlockSpec((1, C, tile), x_pool_map)],
                out_specs=[
                    pl.BlockSpec((1, 1, C, 1), lambda b, c, t: (b, c, 0, 0)),
                    pl.BlockSpec((1, 1, C, 1), lambda b, c, t: (b, c, 0, 0)),
                ],
            ),
            compiler_params=pltpu.CompilerParams(
                dimension_semantics=("parallel", "parallel", "arbitrary"),
                vmem_limit_bytes=vmem_limit),
        )(x_flat)

        out_flat = pl.pallas_call(
            functools.partial(_scale_kernel, HW),
            out_shape=jax.ShapeDtypeStruct((B, C, HW), x.dtype),
            grid_spec=pltpu.PrefetchScalarGridSpec(
                num_scalar_prefetch=0,
                grid=(B, n_total),
                in_specs=[
                    pl.BlockSpec((1, C, tile), lambda b, t: (b, 0, t)),
                    pl.BlockSpec((1, n_chunks, C, 1), lambda b, t: (b, 0, 0, 0)),
                    pl.BlockSpec((1, n_chunks, C, 1), lambda b, t: (b, 0, 0, 0)),
                    pl.BlockSpec((C, Ch), lambda b, t: (0, 0)),
                    pl.BlockSpec((1, Ch), lambda b, t: (0, 0)),
                    pl.BlockSpec((Ch, C), lambda b, t: (0, 0)),
                    pl.BlockSpec((1, C), lambda b, t: (0, 0)),
                ],
                out_specs=pl.BlockSpec((1, C, tile), lambda b, t: (b, 0, t)),
            ),
            compiler_params=pltpu.CompilerParams(
                dimension_semantics=("parallel", "parallel"),
                vmem_limit_bytes=vmem_limit),
            input_output_aliases=({0: 0} if donate_x else {}),
        )(x_flat, psum, pmax, w1t, b1r, w2t, b2r)

    return out_flat.reshape(B, C, H, W)


# ----------------------------------------------------------------------------
# Pure-JAX reference matching the PyTorch forward (BatchNorm in eval mode).
# ----------------------------------------------------------------------------
def channel_attention_ref(x, w1, b1, bn_gamma, bn_beta, bn_mean, bn_var,
                          w2, b2, eps=1e-5):
    def mlp(p):                               # p: (B, C)
        z = p @ w1.T + b1                     # (B, Ch)
        z = (z - bn_mean) / jnp.sqrt(bn_var + eps) * bn_gamma + bn_beta
        z = jnp.maximum(z, 0.0)
        return z @ w2.T + b2                  # (B, C)

    avg = jnp.mean(x, axis=(2, 3))
    mx = jnp.max(x, axis=(2, 3))
    scale = jax.nn.sigmoid(mlp(avg) + mlp(mx))
    return x * scale[:, :, None, None]


if __name__ == "__main__":
    ratio = 16
    key = jax.random.PRNGKey(0)

    def make_params(C, Ch, k):
        ks = jax.random.split(k, 8)
        w1 = jax.random.normal(ks[1], (Ch, C), jnp.float32) * 0.1
        b1 = jax.random.normal(ks[2], (Ch,), jnp.float32) * 0.1
        w2 = jax.random.normal(ks[3], (C, Ch), jnp.float32) * 0.1
        b2 = jax.random.normal(ks[4], (C,), jnp.float32) * 0.1
        g = 1.0 + 0.1 * jax.random.normal(ks[5], (Ch,), jnp.float32)
        bt = 0.1 * jax.random.normal(ks[6], (Ch,), jnp.float32)
        mn = 0.1 * jax.random.normal(ks[7], (Ch,), jnp.float32)
        vr = 1.0 + 0.25 * jax.random.uniform(ks[0], (Ch,), jnp.float32)
        return w1, b1, g, bt, mn, vr, w2, b2

    def check(B, C, H, W, k, **kw):
        Ch = C // ratio
        kx, kp = jax.random.split(k)
        x = jax.random.normal(kx, (B, C, H, W), jnp.float32)
        params = make_params(C, Ch, kp)
        out = jax.block_until_ready(channel_attention(x, *params, **kw))
        ref = channel_attention_ref(x, *params)
        assert out.shape == x.shape
        assert jnp.allclose(out, ref, atol=1e-5, rtol=1e-5), (
            f"mismatch vs reference for shape {(B, C, H, W)} kwargs={kw}")

    keys = jax.random.split(key, 6)
    # fused path: aligned HW, non-aligned HW (no host pad), cdiv batch blocks
    check(2, 64, 16, 16, keys[0])
    check(2, 64, 14, 14, keys[1])
    check(5, 64, 14, 14, keys[2], max_batch_block=2)
    # two-pass fallback: chunked pool (no mask), tail-masked boundary tile,
    # multi-tile accumulation with a fully-OOB (clamped + masked) tile.
    check(2, 64, 16, 16, keys[3], force_two_pass=True, force_tile=128)
    check(2, 64, 14, 14, keys[4], force_two_pass=True, force_tile=128)
    check(1, 64, 28, 28, keys[5], force_two_pass=True, force_tile=128)
    print("KERNEL_OK")
</pallas_src>

<mosaic_0001>
module attributes {stable_mosaic.version = 11 : i64} {
  func.func @_ca_fused_kernel(%arg0: i32, %arg1: memref<2x64x256xf32, #tpu.memory_space<vmem>>, %arg2: memref<64x4xf32, #tpu.memory_space<vmem>>, %arg3: memref<1x4xf32, #tpu.memory_space<vmem>>, %arg4: memref<4x64xf32, #tpu.memory_space<vmem>>, %arg5: memref<1x64xf32, #tpu.memory_space<vmem>>, %arg6: memref<2x64x256xf32, #tpu.memory_space<vmem>>) attributes {dimension_semantics = [#tpu.dimension_semantics<parallel>], iteration_bounds = array<i64: 1>, scalar_prefetch = 0 : i64, scratch_operands = 0 : i64, tpu.core_type = #tpu.core_type<tc>, window_params = [{transform_indices = @transform_0, window_bounds = array<i64: 2, 64, 256>}, {pipeline_mode = #tpu.pipeline_mode<synchronous>, transform_indices = @transform_1, window_bounds = array<i64: 64, 4>}, {pipeline_mode = #tpu.pipeline_mode<synchronous>, transform_indices = @transform_2, window_bounds = array<i64: 1, 4>}, {pipeline_mode = #tpu.pipeline_mode<synchronous>, transform_indices = @transform_3, window_bounds = array<i64: 4, 64>}, {pipeline_mode = #tpu.pipeline_mode<synchronous>, transform_indices = @transform_4, window_bounds = array<i64: 1, 64>}, {transform_indices = @transform_5, window_bounds = array<i64: 2, 64, 256>}]} {
    %c0 = arith.constant 0 : index
    %c0_0 = arith.constant 0 : index
    %c0_1 = arith.constant 0 : index
    %0 = vector.load %arg1[%c0, %c0_0, %c0_1] : memref<2x64x256xf32, #tpu.memory_space<vmem>>, vector<2x64x256xf32>
    %cst = arith.constant dense<0.000000e+00> : vector<2x64xf32>
    %1 = vector.multi_reduction <add>, %0, %cst [2] : vector<2x64x256xf32> to vector<2x64xf32>
    %cst_2 = arith.constant dense<0xFF800000> : vector<2x64xf32>
    %2 = vector.multi_reduction <maximumf>, %0, %cst_2 [2] : vector<2x64x256xf32> to vector<2x64xf32>
    %cst_3 = arith.constant 3.906250e-03 : f32
    %3 = vector.broadcast %cst_3 : f32 to vector<2x64xf32>
    %4 = arith.mulf %1, %3 : vector<2x64xf32>
    %c0_4 = arith.constant 0 : index
    %c0_5 = arith.constant 0 : index
    %5 = vector.load %arg2[%c0_4, %c0_5] : memref<64x4xf32, #tpu.memory_space<vmem>>, vector<64x4xf32>
    %c0_6 = arith.constant 0 : index
    %c0_7 = arith.constant 0 : index
    %6 = vector.load %arg3[%c0_6, %c0_7] : memref<1x4xf32, #tpu.memory_space<vmem>>, vector<1x4xf32>
    %c0_8 = arith.constant 0 : index
    %c0_9 = arith.constant 0 : index
    %7 = vector.load %arg4[%c0_8, %c0_9] : memref<4x64xf32, #tpu.memory_space<vmem>>, vector<4x64xf32>
    %c0_10 = arith.constant 0 : index
    %c0_11 = arith.constant 0 : index
    %8 = vector.load %arg5[%c0_10, %c0_11] : memref<1x64xf32, #tpu.memory_space<vmem>>, vector<1x64xf32>
    %cst_12 = arith.constant dense<0.000000e+00> : vector<2x4xf32>
    %9 = tpu.matmul %4, %5, %cst_12 {dimension_numbers = #tpu.dot_dimension_numbers<[1], [0], [0], [1], [0, 0, 1, 1], [], []>} : vector<2x64xf32>, vector<64x4xf32>, vector<2x4xf32> -> vector<2x4xf32>
    %10 = vector.broadcast %6 : vector<1x4xf32> to vector<2x4xf32>
    %11 = arith.addf %9, %10 : vector<2x4xf32>
    %cst_13 = arith.constant 0.000000e+00 : f32
    %12 = vector.broadcast %cst_13 : f32 to vector<2x4xf32>
    %13 = arith.maximumf %11, %12 : vector<2x4xf32>
    %cst_14 = arith.constant dense<0.000000e+00> : vector<2x64xf32>
    %14 = tpu.matmul %13, %7, %cst_14 {dimension_numbers = #tpu.dot_dimension_numbers<[1], [0], [0], [1], [0, 0, 1, 1], [], []>} : vector<2x4xf32>, vector<4x64xf32>, vector<2x64xf32> -> vector<2x64xf32>
    %15 = vector.broadcast %8 : vector<1x64xf32> to vector<2x64xf32>
    %16 = arith.addf %14, %15 : vector<2x64xf32>
    %cst_15 = arith.constant dense<0.000000e+00> : vector<2x4xf32>
    %17 = tpu.matmul %2, %5, %cst_15 {dimension_numbers = #tpu.dot_dimension_numbers<[1], [0], [0], [1], [0, 0, 1, 1], [], []>} : vector<2x64xf32>, vector<64x4xf32>, vector<2x4xf32> -> vector<2x4xf32>
    %18 = vector.broadcast %6 : vector<1x4xf32> to vector<2x4xf32>
    %19 = arith.addf %17, %18 : vector<2x4xf32>
    %cst_16 = arith.constant 0.000000e+00 : f32
    %20 = vector.broadcast %cst_16 : f32 to vector<2x4xf32>
    %21 = arith.maximumf %19, %20 : vector<2x4xf32>
    %cst_17 = arith.constant dense<0.000000e+00> : vector<2x64xf32>
    %22 = tpu.matmul %21, %7, %cst_17 {dimension_numbers = #tpu.dot_dimension_numbers<[1], [0], [0], [1], [0, 0, 1, 1], [], []>} : vector<2x4xf32>, vector<4x64xf32>, vector<2x64xf32> -> vector<2x64xf32>
    %23 = vector.broadcast %8 : vector<1x64xf32> to vector<2x64xf32>
    %24 = arith.addf %22, %23 : vector<2x64xf32>
    %25 = arith.addf %16, %24 : vector<2x64xf32>
    %26 = arith.negf %25 : vector<2x64xf32>
    %27 = math.exp %26 : vector<2x64xf32>
    %cst_18 = arith.constant 1.000000e+00 : f32
    %28 = vector.broadcast %cst_18 : f32 to vector<2x64xf32>
    %29 = arith.addf %28, %27 : vector<2x64xf32>
    %30 = arith.divf %28, %29 : vector<2x64xf32>
    %31 = vector.shape_cast %30 : vector<2x64xf32> to vector<2x64x1xf32>
    %32 = vector.broadcast %31 : vector<2x64x1xf32> to vector<2x64x256xf32>
    %33 = arith.mulf %0, %32 : vector<2x64x256xf32>
    %c0_19 = arith.constant 0 : index
    %c0_20 = arith.constant 0 : index
    %c0_21 = arith.constant 0 : index
    %34 = vector.load %arg6[%c0_19, %c0_20, %c0_21] : memref<2x64x256xf32, #tpu.memory_space<vmem>>, vector<2x64x256xf32>
    tpu.vector_store %arg6[%c0_19, %c0_20, %c0_21], %33 {strides = array<i32>} : memref<2x64x256xf32, #tpu.memory_space<vmem>>, vector<2x64x256xf32>,
    return
  }
  func.func @transform_0(%arg0: i32) -> (i32, i32, i32) {
    %c0_i32 = arith.constant 0 : i32
    %c0_i32_0 = arith.constant 0 : i32
    %c0_i32_1 = arith.constant 0 : i32
    return %arg0, %c0_i32, %c0_i32_0 : i32, i32, i32
  }
  func.func @transform_1(%arg0: i32) -> (i32, i32) {
    %c0_i32 = arith.constant 0 : i32
    %c0_i32_0 = arith.constant 0 : i32
    %c0_i32_1 = arith.constant 0 : i32
    return %c0_i32, %c0_i32_0 : i32, i32
  }
  func.func @transform_2(%arg0: i32) -> (i32, i32) {
    %c0_i32 = arith.constant 0 : i32
    %c0_i32_0 = arith.constant 0 : i32
    %c0_i32_1 = arith.constant 0 : i32
    return %c0_i32, %c0_i32_0 : i32, i32
  }
  func.func @transform_3(%arg0: i32) -> (i32, i32) {
    %c0_i32 = arith.constant 0 : i32
    %c0_i32_0 = arith.constant 0 : i32
    %c0_i32_1 = arith.constant 0 : i32
    return %c0_i32, %c0_i32_0 : i32, i32
  }
  func.func @transform_4(%arg0: i32) -> (i32, i32) {
    %c0_i32 = arith.constant 0 : i32
    %c0_i32_0 = arith.constant 0 : i32
    %c0_i32_1 = arith.constant 0 : i32
    return %c0_i32, %c0_i32_0 : i32, i32
  }
  func.func @transform_5(%arg0: i32) -> (i32, i32, i32) {
    %c0_i32 = arith.constant 0 : i32
    %c0_i32_0 = arith.constant 0 : i32
    %c0_i32_1 = arith.constant 0 : i32
    return %arg0, %c0_i32, %c0_i32_0 : i32, i32, i32
  }
}

</mosaic_0001>

<bundles_post_ra>
// kernel: tpu_custom_call.1
= control target key start
LH: loop header
LB: loop body
LE: loop exit
PB: predicated region body
PF: predicated region fallthrough
CT: control target
= control target key end

     0   :  { %10 = vsyncpa [#allocation3], 0  ;;  %s1410_s0 = inlined_call_operand.hbm [shape: f32[2,64,256], index: 0, kind: input, shape index: {}]   ;;  %s1411_s1 = inlined_call_operand.vmem [shape: f32[64,4], index: 1, kind: input, shape index: {}]   ;;  %s1412_s2 = inlined_call_operand.vmem [shape: f32[1,4], index: 2, kind: input, shape index: {}]   ;;  %s1413_s3 = inlined_call_operand.vmem [shape: f32[4,64], index: 3, kind: input, shape index: {}]   ;;  %s1414_s4 = inlined_call_operand.vmem [shape: f32[1,64], index: 4, kind: input, shape index: {}]   ;;  %s1415_s5 = inlined_call_operand.hbm [shape: f32[2,64,256], index: 5, kind: output, shape index: {}]  }
   0x1   :  { %11 = vsyncpa [#allocation4], 0  ;;  %s1030_s18 = smov [#allocation2]   ;;  %s982_s22 = scalar_lea.hbm %s1410_s0, 4096 }
   0x2   :  { %s17_s19 = sshll.u32 %s1030_s18, 4  ;;  %p983_p0 = scmp.ne.s32.totalorder %s1410_s0, %s982_s22  ;;  %s18_s19 = int_to_ptr.vmem [resolvable:$true] %s17_s19 }
   0x3   :  { %p986_p1 = scmp.lt.u32.totalorder %s982_s22, %s1410_s0 }
   0x5   :  { %p988_p2 = pnand %p986_p1, %p983_p0 }
   0x7   :  { %991 = shalt.err (!%p988_p2)
}
   0x8   :  { %s992_s27 = scalar_lea.vmem %s18_s19, 4096  ;;  %p997_p4 = scmp.lt.s32.totalorder %s18_s19, %s18_s19 }
   0x9   :  { %p993_p3 = scmp.ne.s32.totalorder %s18_s19, %s992_s27  ;;  %p998_p5 = scmp.lt.s32.totalorder %s992_s27, %s992_s27 }
   0xb   :  { %p999_p6 = por %p998_p5, %p997_p4 }
   0xd   :  { %p1000_p7 = pnand %p999_p6, %p993_p3 }
   0xf   :  { %1003 = shalt.err (!%p1000_p7)
}
  0x10   :  { %s1031_s28 = smov 256   ;;  %s1032_s29 = smov 16  }
  0x11   :  { %23 = dma.hbm_to_vmem [thread:$0]  %s1410_s0, 4096, %s18_s19, [#allocation3], %s1031_s28, %s1031_s28, %s1032_s29  }
  0x12   :  { %1026 = dma.done.wait [#allocation3], 4096  }
  0x13   :  { %1027 = vsyncadd [#allocation3], 4294963200  ;;  %v1082_v0 = vld [vmem:[#allocation2 + $0x80] sm:$0xff]  ;;  %v1084_v1 = vld [vmem:[#allocation2 + $0x88] sm:$0xff]  ;;  %v1033_v61 = vmov 0.0|0.0   ;;  %vm1034_vm0 = vmmov 0  }
  0x14   :  { %v1086_v2 = vld [vmem:[#allocation2] sm:$0xff]  ;;  %v91_v3 = vadd.f32 %v1084_v1, %v1082_v0  ;;  %v1090_v4 = vld [vmem:[#allocation2 + $0x8] sm:$0xff]  ;;  %v1092_v5 = vld [vmem:[#allocation2 + $0x90] sm:$0xff]  ;;  %v139_v39 = vmax.f32 %v1082_v0, %v1084_v1  ;;  %944 = vmatprep.subr.bf16.mxu0 %v1033_v61  ;;  %956 = vmatprep.subr.bf16.mxu1 %v1033_v61  ;;  %vm223_vm1 = vcmask 130112   ;;  %vm230_vm2 = vcmask 195712  }
  0x15   :  { %v1094_v6 = vld [vmem:[#allocation2 + $0x98] sm:$0xff]  ;;  %v67_v7 = vadd.f32 %v1090_v4, %v1086_v2  ;;  %v1098_v8 = vld [vmem:[#allocation2 + $0x10] sm:$0xff]  ;;  %v1106_v12 = vld [vmem:[#allocation2 + $0xa0] sm:$0xff]  ;;  %v115_v37 = vmax.f32 %v1086_v2, %v1090_v4  ;;  %vm237_vm3 = vcmask 261312   ;;  %vm244_vm4 = vcmask 326912  }
  0x16   :  { %v1100_v9 = vld [vmem:[#allocation2 + $0x18] sm:$0xff]  ;;  %92 = vadd.xlane.f32.xlu1 %v91_v3  ;;  %v94_v10 = vadd.f32 %v1094_v6, %v1092_v5  ;;  %v1108_v13 = vld [vmem:[#allocation2 + $0xa8] sm:$0xff]  ;;  %v1110_v14 = vld [vmem:[#allocation2 + $0x20] sm:$0xff]  ;;  %v142_v38 = vmax.f32 %v1092_v5, %v1094_v6  ;;  %vm251_vm5 = vcmask 392512   ;;  %vm258_vm6 = vcmask 458112  }
  0x17   :  { %68 = vadd.xlane.f32.xlu0 %v67_v7  ;;  %v70_v11 = vadd.f32 %v1100_v9, %v1098_v8  ;;  %v1112_v15 = vld [vmem:[#allocation2 + $0x28] sm:$0xff]  ;;  %v97_v16 = vadd.f32 %v1108_v13, %v1106_v12  ;;  %v1118_v18 = vld [vmem:[#allocation2 + $0xb0] sm:$0xff]  ;;  %v1120_v19 = vld [vmem:[#allocation2 + $0xb8] sm:$0xff]  ;;  %v118_v36 = vmax.f32 %v1098_v8, %v1100_v9  ;;  %v145_v46 = vmax.f32 %v1106_v12, %v1108_v13 }
  0x18   :  { %v73_v17 = vadd.f32 %v1112_v15, %v1110_v14  ;;  %1427 = vst [vmem:[#allocation8_spill] sm:$0xff] %v1118_v18  ;;  %1428 = vst [vmem:[#allocation9_spill] sm:$0xff] %v1120_v19  ;;  %v1122_v20 = vld [vmem:[#allocation2 + $0x30] sm:$0xff]  ;;  %v1124_v21 = vld [vmem:[#allocation2 + $0x38] sm:$0xff]  ;;  %v100_v22 = vadd.f32 %v1120_v19, %v1118_v18  ;;  %v121_v47 = vmax.f32 %v1110_v14, %v1112_v15  ;;  %vm265_vm7 = vcmask 523712  }
  0x19   :  { %v76_v23 = vadd.f32 %v1124_v21, %v1122_v20  ;;  %v1130_v24 = vld [vmem:[#allocation2 + $0xc0] sm:$0xff]  ;;  %v1132_v25 = vld [vmem:[#allocation2 + $0xc8] sm:$0xff]  ;;  %v1142_v30 = vld [vmem:[#allocation2 + $0xd0] sm:$0xff]  ;;  %v148_v54 = vmax.f32 %v1118_v18, %v1120_v19  ;;  %v124_v55 = vmax.f32 %v1122_v20, %v1124_v21  ;;  %vm306_vm8 = vcmask 1041409  }
  0x1a   :  { %95 = vadd.xlane.f32.xlu1 %v94_v10  ;;  %1429 = vst [vmem:[#allocation10_spill] sm:$0xff] %v1132_v25  ;;  %v1134_v26 = vld [vmem:[#allocation2 + $0x40] sm:$0xff]  ;;  %v1136_v27 = vld [vmem:[#allocation2 + $0x48] sm:$0xff]  ;;  %v103_v28 = vadd.f32 %v1132_v25, %v1130_v24  ;;  %1430 = vst [vmem:[#allocation11_spill] sm:$0xff] %v1142_v30  ;;  %v151_v58 = vmax.f32 %v1130_v24, %v1132_v25  ;;  %vm308_vm9 = vcmask 523264   ;;  %vm392_vm10 = vcmask 1043456  }
  0x1b   :  { %71 = vadd.xlane.f32.xlu0 %v70_v11  ;;  %v79_v29 = vadd.f32 %v1136_v27, %v1134_v26  ;;  %v1144_v31 = vld [vmem:[#allocation2 + $0xd8] sm:$0xff]  ;;  %v1146_v32 = vld [vmem:[#allocation2 + $0x50] sm:$0xff]  ;;  %v1162_v40 = vld [vmem:[#allocation2 + $0xe0] sm:$0xff]  ;;  %v127_v60 = vmax.f32 %v1134_v26, %v1136_v27  ;;  %vm388_vm11 = vcmask 31744  }
  0x1c   :  { %1431 = vst [vmem:[#allocation12_spill] sm:$0xff] %v1144_v31  ;;  %v1148_v33 = vld [vmem:[#allocation2 + $0x58] sm:$0xff]  ;;  %v106_v34 = vadd.f32 %v1144_v31, %v1142_v30  ;;  %1432 = vst [vmem:[#allocation13_spill] sm:$0xff] %v1162_v40  ;;  %v1164_v41 = vld [vmem:[#allocation2 + $0xe8] sm:$0xff]  ;;  %v154_v3 = vmax.f32 %v1142_v30, %v1144_v31 }
  0x1d   :  { %v82_v35 = vadd.f32 %v1148_v33, %v1146_v32  ;;  %1433 = vst [vmem:[#allocation14_spill] sm:$0xff] %v1164_v41  ;;  %v1166_v42 = vld [vmem:[#allocation2 + $0x60] sm:$0xff]  ;;  %v1168_v43 = vld [vmem:[#allocation2 + $0x68] sm:$0xff]  ;;  %v109_v44 = vadd.f32 %v1164_v41, %v1162_v40  ;;  %v1178_v48 = vld [vmem:[#allocation2 + $0xf0] sm:$0xff]  ;;  %v130_v10 = vmax.f32 %v1146_v32, %v1148_v33 }
  0x1e   :  { %98 = vadd.xlane.f32.xlu1 %v97_v16  ;;  %v85_v45 = vadd.f32 %v1168_v43, %v1166_v42  ;;  %1434 = vst [vmem:[#allocation15_spill] sm:$0xff] %v1178_v48  ;;  %v1180_v49 = vld [vmem:[#allocation2 + $0xf8] sm:$0xff]  ;;  %v1182_v50 = vld [vmem:[#allocation2 + $0x70] sm:$0xff]  ;;  %v179_v56 = vld [vmem:[%s1411_s1] sm:$0xff] }
  0x1f   :  { %74 = vadd.xlane.f32.xlu0 %v73_v17  ;;  %1435 = vst [vmem:[#allocation16_spill] sm:$0xff] %v1180_v49  ;;  %v1184_v51 = vld [vmem:[#allocation2 + $0x78] sm:$0xff]  ;;  %v112_v52 = vadd.f32 %v1180_v49, %v1178_v48  ;;  %v180_v57 = vld [vmem:[%s1411_s1 + $0x8] sm:$0xff]  ;;  %v181_v62 = vld [vmem:[%s1411_s1 + $0x10] sm:$0xff]  ;;  %v157_v17 = vmax.f32 %v1162_v40, %v1164_v41 }
  0x20   :  { %v88_v53 = vadd.f32 %v1184_v51, %v1182_v50  ;;  %v945_v59 = vpack.c.bf16 %v180_v57, %v179_v56  ;;  %v182_v63 = vld [vmem:[%s1411_s1 + $0x18] sm:$0xff]  ;;  %v183_v11 = vld [vmem:[%s1411_s1 + $0x20] sm:$0xff]  ;;  %v184_v16 = vld [vmem:[%s1411_s1 + $0x28] sm:$0xff]  ;;  %v212_v56 = vlaneseq }
  0x21   :  { %v948_v7 = vpack.c.bf16 %v182_v63, %v181_v62 }
  0x22   :  { %101 = vadd.xlane.f32.xlu1 %v100_v22  ;;  %946 = vmatpush3.bf16.msra.mxu0 %v945_v59  ;;  %v951_v22 = vpack.c.bf16 %v184_v16, %v183_v11 }
  0x23   :  { %77 = vadd.xlane.f32.xlu0 %v76_v23  ;;  %947 = vmatprep.subr.bf16.mxu0 %v1033_v61  ;;  %v133_v23 = vmax.f32 %v1166_v42, %v1168_v43 }
  0x24   :  { %958 = vmatpush3.bf16.msra.mxu1 %v945_v59  ;;  %v213_v59 = vand.u32 127, %v212_v56 }
  0x25   :  { %959 = vmatprep.subr.bf16.mxu1 %v1033_v61 }
  0x26   :  { %104 = vadd.xlane.f32.xlu1 %v103_v28  ;;  %949 = vmatpush3.bf16.msra.mxu0 %v948_v7  ;;  %v185_v28 = vld [vmem:[%s1411_s1 + $0x30] sm:$0xff]  ;;  %v218_v63 = vadd.s32 4294967288, %v213_v59  ;;  %v246_v11 = vadd.s32 4294967256, %v213_v59  ;;  %v260_v19 = vadd.s32 4294967240, %v213_v59 }
  0x27   :  { %80 = vadd.xlane.f32.xlu0 %v79_v29  ;;  %950 = vmatprep.subr.bf16.mxu0 %v1033_v61  ;;  %v186_v29 = vld [vmem:[%s1411_s1 + $0x38] sm:$0xff] }
  0x28   :  { %961 = vmatpush3.bf16.msra.mxu1 %v948_v7  ;;  %v232_v7 = vadd.s32 4294967272, %v213_v59 }
  0x29   :  { %962 = vmatprep.subr.bf16.mxu1 %v1033_v61 }
  0x2a   :  { %107 = vadd.xlane.f32.xlu1 %v106_v34  ;;  %952 = vmatpush3.bf16.msra.mxu0 %v951_v22  ;;  %v160_v34 = vmax.f32 %v1178_v48, %v1180_v49 }
  0x2b   :  { %83 = vadd.xlane.f32.xlu0 %v82_v35  ;;  %953 = vmatprep.subr.bf16.mxu0 %v1033_v61  ;;  %v954_v35 = vpack.c.bf16 %v186_v29, %v185_v28  ;;  %v253_v29 = vadd.s32 4294967248, %v213_v59 }
  0x2c   :  { %964 = vmatpush3.bf16.msra.mxu1 %v951_v22 }
  0x2d   :  { %965 = vmatprep.subr.bf16.mxu1 %v1033_v61  ;;  %v1242_v61 = vshrl.u32 %v212_v56, 7 }
  0x2e   :  { %119 = vmax.xlane.f32.xlu1 %v118_v36  ;;  %v136_v36 = vmax.f32 %v1182_v50, %v1184_v51  ;;  %955 = vmatpush3.bf16.msra.mxu0 %v954_v35 }
  0x2f   :  { %116 = vmax.xlane.f32.xlu0 %v115_v37  ;;  %v1416_v37 = vmov 0.0   ;;  %v1266_v49 = vsub.s32 %v246_v11, %v1242_v61  ;;  %v1269_v40 = vsub.s32 %v253_v29, %v1242_v61 }
  0x30   :  { %967 = vmatpush3.bf16.msra.mxu1 %v954_v35  ;;  %912 = vmatprep.mubr.msk.f32.mxu0 %vm1034_vm0, %v1416_v37  ;;  %v1260_v35 = vsub.s32 %v232_v7, %v1242_v61 }
  0x31   :  { %936 = vmatprep.mubr.msk.f32.mxu1 %vm1034_vm0, %v1416_v37  ;;  %915 = vmatprep.subr.mxu0 %v1416_v37 }
  0x32   :  { %143 = vmax.xlane.f32.xlu1 %v142_v38  ;;  %939 = vmatprep.subr.mxu1 %v1416_v37 }
  0x33   :  { %140 = vmax.xlane.f32.xlu0 %v139_v39 }
  0x36   :  { %110 = vadd.xlane.f32.xlu1 %v109_v44 }
  0x37   :  { %86 = vadd.xlane.f32.xlu0 %v85_v45 }
  0x3a   :  { %146 = vmax.xlane.f32.xlu1 %v145_v46 }
  0x3b   :  { %122 = vmax.xlane.f32.xlu0 %v121_v47 }
  0x3e   :  { %113 = vadd.xlane.f32.xlu1 %v112_v52 }
  0x3f   :  { %89 = vadd.xlane.f32.xlu0 %v88_v53 }
  0x42   :  { %149 = vmax.xlane.f32.xlu1 %v148_v54 }
  0x43   :  { %125 = vmax.xlane.f32.xlu0 %v124_v55 }
  0x46   :  { %152 = vmax.xlane.f32.xlu1 %v151_v58 }
  0x47   :  { %128 = vmax.xlane.f32.xlu0 %v127_v60 }
  0x4a   :  { %155 = vmax.xlane.f32.xlu1 %v154_v3  ;;  %v225_v3 = vadd.s32 4294967280, %v213_v59 }
  0x4b   :  { %131 = vmax.xlane.f32.xlu0 %v130_v10  ;;  %v239_v10 = vadd.s32 4294967264, %v213_v59 }
  0x4c   :  { %v1257_v28 = vsub.s32 %v225_v3, %v1242_v61 }
  0x4e   :  { %158 = vmax.xlane.f32.xlu1 %v157_v17  ;;  %v1249_v17 = vsub.s32 %v213_v59, %v1242_v61 }
  0x4f   :  { %134 = vmax.xlane.f32.xlu0 %v133_v23  ;;  %v1254_v23 = vsub.s32 %v218_v63, %v1242_v61 }
  0x52   :  { %161 = vmax.xlane.f32.xlu1 %v160_v34 }
  0x53   :  { %137 = vmax.xlane.f32.xlu0 %v136_v36  ;;  %v1263_v36 = vsub.s32 %v239_v10, %v1242_v61 }
  0xa3   :  { %v93_v38 = vpop.xlane.xlu1 %92 }
  0xa4   :  { %v69_v39 = vpop.xlane.xlu0 %68  ;;  %v171_v48 = vmul.f32 0.00390625, %v93_v38 }
  0xa7   :  { %v96_v44 = vpop.xlane.xlu1 %95 }
  0xa8   :  { %v72_v45 = vpop.xlane.xlu0 %71  ;;  %v172_v34 = vmul.f32 0.00390625, %v96_v44  ;;  %v163_v44 = vmul.f32 0.00390625, %v69_v39  ;;  %v270_v39 = vrot.slane %v171_v48, %v1249_v17 }
  0xa9   :  { %v164_v56 = vmul.f32 0.00390625, %v72_v45 }
  0xaa   :  { %v274_v10 = vrot.slane %v172_v34, %v1254_v23  ;;  %v1288_v34 = vsub.s32 %v260_v19, %v1242_v61 }
  0xab   :  { %v99_v46 = vpop.xlane.xlu1 %98  ;;  %v222_v11 = vrot.slane %v164_v56, %v1254_v23 }
  0xac   :  { %v75_v47 = vpop.xlane.xlu0 %74  ;;  %v173_v37 = vmul.f32 0.00390625, %v99_v46 }
  0xad   :  { %v165_v3 = vmul.f32 0.00390625, %v75_v47 }
  0xae   :  { %v279_v18 = vrot.slane %v173_v37, %v1257_v28  ;;  %v275_v37 = vsel %vm223_vm1, %v274_v10, %v270_v39 }
  0xaf   :  { %v102_v52 = vpop.xlane.xlu1 %101 }
  0xb0   :  { %v78_v53 = vpop.xlane.xlu0 %77  ;;  %v174_v31 = vmul.f32 0.00390625, %v102_v52 }
  0xb1   :  { %v166_v41 = vmul.f32 0.00390625, %v78_v53  ;;  %v229_v53 = vrot.slane %v165_v3, %v1257_v28 }
  0xb3   :  { %v105_v54 = vpop.xlane.xlu1 %104 }
  0xb4   :  { %v81_v55 = vpop.xlane.xlu0 %80  ;;  %v175_v7 = vmul.f32 0.00390625, %v105_v54  ;;  %v284_v54 = vrot.slane %v174_v31, %v1260_v35  ;;  %v280_v31 = vsel %vm230_vm2, %v279_v18, %v275_v37 }
  0xb5   :  { %v167_v45 = vmul.f32 0.00390625, %v81_v55  ;;  %v217_v55 = vrot.slane %v163_v44, %v1249_v17 }
  0xb6   :  { %v289_v59 = vrot.slane %v175_v7, %v1263_v36  ;;  %v285_v44 = vsel %vm237_vm3, %v284_v54, %v280_v31  ;;  %v1436_v31 = vmov 0.0  }
  0xb7   :  { %v108_v57 = vpop.xlane.xlu1 %107 }
  0xb8   :  { %v84_v58 = vpop.xlane.xlu0 %83  ;;  %v176_v46 = vmul.f32 0.00390625, %v108_v57  ;;  %v236_v57 = vrot.slane %v166_v41, %v1260_v35 }
  0xb9   :  { %v168_v38 = vmul.f32 0.00390625, %v84_v58  ;;  %v243_v58 = vrot.slane %v167_v45, %v1263_v36 }
  0xba   :  { %v294_v48 = vrot.slane %v176_v46, %v1266_v49  ;;  %v290_v46 = vsel %vm244_vm4, %v289_v59, %v285_v44 }
  0xbb   :  { %v1240_v60 = vpop.xlane.xlu1 %119  ;;  %v250_v56 = vrot.slane %v168_v38, %v1266_v49 }
  0xbc   :  { %v1244_v62 = vpop.xlane.xlu0 %116  ;;  %v295_v38 = vsel %vm251_vm5, %v294_v48, %v290_v46  ;;  %v489_v44 = vrot.slane %v1240_v60, %v1254_v23 }
  0xbf   :  { %v1246_v16 = vpop.xlane.xlu1 %143 }
  0xc0   :  { %v1251_v22 = vpop.xlane.xlu0 %140 }
  0xc3   :  { %v111_v63 = vpop.xlane.xlu1 %110 }
  0xc4   :  { %v87_v30 = vpop.xlane.xlu0 %86  ;;  %v177_v47 = vmul.f32 0.00390625, %v111_v63 }
  0xc5   :  { %v169_v29 = vmul.f32 0.00390625, %v87_v30  ;;  %v224_v30 = vsel %vm223_vm1, %v222_v11, %v217_v55 }
  0xc6   :  { %v299_v41 = vrot.slane %v177_v47, %v1269_v40  ;;  %v231_v3 = vsel %vm230_vm2, %v229_v53, %v224_v30 }
  0xc7   :  { %v1274_v52 = vpop.xlane.xlu1 %146  ;;  %v257_v7 = vrot.slane %v169_v29, %v1269_v40  ;;  %v238_v19 = vsel %vm237_vm3, %v236_v57, %v231_v3 }
  0xc8   :  { %v1279_v25 = vpop.xlane.xlu0 %122  ;;  %v245_v18 = vsel %vm244_vm4, %v243_v58, %v238_v19  ;;  %v300_v53 = vsel %vm258_vm6, %v299_v41, %v295_v38  ;;  %v528_v41 = vrot.slane %v1246_v16, %v1254_v23 }
  0xc9   :  { %v252_v39 = vsel %vm251_vm5, %v250_v56, %v245_v18 }
  0xca   :  { %v259_v55 = vsel %vm258_vm6, %v257_v7, %v252_v39  ;;  %v485_v7 = vrot.slane %v1244_v62, %v1249_v17 }
  0xcb   :  { %v114_v63 = vpop.xlane.xlu1 %113 }
  0xcc   :  { %v178_v10 = vmul.f32 0.00390625, %v114_v63  ;;  %v90_v45 = vpop.xlane.xlu0 %89  ;;  %v524_v63 = vrot.slane %v1251_v22, %v1249_v17  ;;  %v490_v17 = vsel %vm223_vm1, %v489_v44, %v485_v7 }
  0xcd   :  { %v170_v11 = vmul.f32 0.00390625, %v90_v45  ;;  %v494_v45 = vrot.slane %v1279_v25, %v1257_v28 }
  0xce   :  { %v304_v47 = vrot.slane %v178_v10, %v1288_v34  ;;  %v533_v10 = vrot.slane %v1274_v52, %v1257_v28 }
  0xcf   :  { %v264_v54 = vrot.slane %v170_v11, %v1288_v34  ;;  %v150_v29 = vpop.xlane.xlu1 %149  ;;  %v529_v11 = vsel %vm223_vm1, %v528_v41, %v524_v63 }
  0xd0   :  { %v126_v57 = vpop.xlane.xlu0 %125  ;;  %v305_v59 = vsel %vm265_vm7, %v304_v47, %v300_v53  ;;  %v538_v19 = vrot.slane %v150_v29, %v1260_v35  ;;  %v534_v52 = vsel %vm230_vm2, %v533_v10, %v529_v11 }
  0xd1   :  { %v266_v37 = vsel %vm265_vm7, %v264_v54, %v259_v55  ;;  %v499_v16 = vrot.slane %v126_v57, %v1260_v35  ;;  %v495_v35 = vsel %vm230_vm2, %v494_v45, %v490_v17 }
  0xd2   :  { %v307_v58 = vsel %vm306_vm8, %v305_v59, %v266_v37  ;;  %v539_v18 = vsel %vm237_vm3, %v538_v19, %v534_v52 }
  0xd3   :  { %913 = vmatmul.mubr.msk.f32.vlgmr.msra.gmra.mrb[0].mxu0 %vm308_vm9, %v307_v58  ;;  %v153_v48 = vpop.xlane.xlu1 %152  ;;  %v500_v47 = vsel %vm237_vm3, %v499_v16, %v495_v35  ;;  %v867_v16 = vld [vmem:[%s1414_s4] ss:$0 sm:$0xff] }
  0xd4   :  { %v129_v30 = vpop.xlane.xlu0 %128  ;;  %917 = vmatprep.mubr.msk.f32.mxu0 %vm1034_vm0, %v1436_v31  ;;  %v543_v46 = vrot.slane %v153_v48, %v1263_v36 }
  0xd5   :  { %v504_v60 = vrot.slane %v129_v30, %v1263_v36  ;;  %v188_v30 = vld [vmem:[%s1413_s3] sm:$0xf] }
  0xd6   :  { %v544_v36 = vsel %vm244_vm4, %v543_v46, %v539_v18  ;;  %916 = vmatpush3.msk.msra.mxu0 %vm392_vm10, %v188_v30  ;;  %v968_v46 = vadd.f32 %v867_v16, %v867_v16  ;;  %v751_v18 = vsub.s32 1, %v1242_v61  ;;  %v1443_v16 = vld [vmem:[#allocation12_spill] sm:$0xff] }
  0xd7   :  { %v156_v56 = vpop.xlane.xlu1 %155  ;;  %v505_v53 = vsel %vm244_vm4, %v504_v60, %v500_v47 }
  0xd8   :  { %v132_v3 = vpop.xlane.xlu0 %131  ;;  %v548_v23 = vrot.slane %v156_v56, %v1266_v49 }
  0xd9   :  { %v509_v25 = vrot.slane %v132_v3, %v1266_v49 }
  0xda   :  { %v549_v54 = vsel %vm251_vm5, %v548_v23, %v544_v36 }
  0xdb   :  { %v159_v22 = vpop.xlane.xlu1 %158  ;;  %v510_v55 = vsel %vm251_vm5, %v509_v25, %v505_v53  ;;  %v716_v25 = vsub.s32 0, %v1242_v61 }
  0xdc   :  { %v135_v62 = vpop.xlane.xlu0 %134  ;;  %v553_v28 = vrot.slane %v159_v22, %v1269_v40 }
  0xdd   :  { %v514_v38 = vrot.slane %v135_v62, %v1269_v40 }
  0xde   :  { %v554_v57 = vsel %vm258_vm6, %v553_v28, %v549_v54 }
  0xdf   :  { %v162_v39 = vpop.xlane.xlu1 %161  ;;  %v515_v40 = vsel %vm258_vm6, %v514_v38, %v510_v55 }
  0xe0   :  { %v558_v29 = vrot.slane %v162_v39, %v1288_v34  ;;  %v138_v49 = vpop.xlane.xlu0 %137 }
  0xe1   :  { %v519_v59 = vrot.slane %v138_v49, %v1288_v34  ;;  %v865_v34 = vld [vmem:[%s1412_s2] ss:$0 sm:$0xff]  ;;  %s1036_s2 = smov [#allocation5]  }
  0xe2   :  { %v559_v37 = vsel %vm265_vm7, %v558_v29, %v554_v57  ;;  %s853_s4 = sshll.u32 %s1036_s2, 4  ;;  %s854_s4 = int_to_ptr.vmem [resolvable:$true] %s853_s4 }
  0xe3   :  { %v520_v58 = vsel %vm265_vm7, %v519_v59, %v515_v40  ;;  %s1004_s26 = scalar_lea.vmem %s854_s4, 4096  ;;  %p1009_p9 = scmp.lt.s32.totalorder %s854_s4, %s854_s4 }
  0xe4   :  { %v560_v48 = vsel %vm306_vm8, %v559_v37, %v520_v58  ;;  %p1005_p8 = scmp.ne.s32.totalorder %s854_s4, %s1004_s26  ;;  %p1010_p10 = scmp.lt.s32.totalorder %s1004_s26, %s1004_s26 }
  0xe5   :  { %937 = vmatmul.mubr.msk.f32.vlgmr.msra.gmra.mrb[0].mxu1 %vm308_vm9, %v560_v48 }
  0xe6   :  { %941 = vmatprep.mubr.msk.f32.mxu1 %vm1034_vm0, %v1436_v31  ;;  %940 = vmatpush3.msk.msra.mxu1 %vm392_vm10, %v188_v30  ;;  %p1011_p11 = por %p1010_p10, %p1009_p9 }
  0xe8   :  { %p1012_p12 = pnand %p1011_p11, %p1005_p8 }
 0x1a6   :  { %v377_v56 = vpop.f32.mrb[0].mxu0 }
 0x1a7   :  { %v378_v41 = vadd.f32 %v865_v34, %v377_v56  ;;  %v914_v63 = vpop.f32.mrb[1].mxu0 }
 0x1a8   :  { %v1437_v63 = vld [vmem:[#allocation10_spill] sm:$0xff] }
 0x1a9   :  { %v381_v3 = vmax.f32 %v378_v41, 0.0 }
 0x1ab   :  { %918 = vmatmul.mubr.msk.f32.vlgmr.msra.gmra.mrb[2].mxu0 %vm388_vm11, %v381_v3 }
 0x1b8   :  { %v629_v44 = vpop.f32.mrb[0].mxu1 }
 0x1b9   :  { %v630_v7 = vadd.f32 %v865_v34, %v629_v44  ;;  %v938_v31 = vpop.f32.mrb[1].mxu1  ;;  %v1439_v44 = vld [vmem:[#allocation9_spill] sm:$0xff] }
 0x1ba   :  { %v1440_v31 = vld [vmem:[#allocation13_spill] sm:$0xff] }
 0x1bb   :  { %v633_v10 = vmax.f32 %v630_v7, 0.0 }
 0x1bd   :  { %942 = vmatmul.mubr.msk.f32.vlgmr.msra.gmra.mrb[2].mxu1 %vm388_vm11, %v633_v10 }
 0x27e   :  { %v462_v45 = vpop.f32.mrb[2].mxu0 }
 0x27f   :  { %v919_v19 = vpop.f32.mrb[3].mxu0  ;;  %v969_v22 = vadd.f32 %v968_v46, %v462_v45  ;;  %v1441_v45 = vld [vmem:[#allocation14_spill] sm:$0xff] }
 0x290   :  { %v703_v11 = vpop.f32.mrb[2].mxu1 }
 0x291   :  { %v970_v60 = vadd.f32 %v969_v22, %v703_v11  ;;  %v943_v23 = vpop.f32.mrb[3].mxu1  ;;  %v1444_v11 = vld [vmem:[#allocation15_spill] sm:$0xff] }
 0x292   :  { %v1445_v23 = vld [vmem:[#allocation16_spill] sm:$0xff] }
 0x293   :  { %v873_v62 = vmul.f32 -1.442695, %v970_v60 }
 0x295   :  { %978 = vpow2.f32 %v873_v62 }
 0x29f   :  { %v979_v17 = vpop.eup %978 }
 0x2a0   :  { %v711_v52 = vadd.f32 1.0, %v979_v17 }
 0x2a2   :  { %980 = vrcp.f32 %v711_v52 }
 0x2ac   :  { %v981_v28 = vpop.eup %980 }
 0x2ad   :  { %v717_v35 = vrot.slane %v981_v28, %v716_v25  ;;  %v752_v38 = vrot.slane %v981_v28, %v751_v18 }
 0x2af   :  { %723 = vbcast.lane.b32.xlu1 %v717_v35, 264  ;;  %719 = vbcast.lane.b32.xlu0 %v717_v35, 256 }
 0x2b3   :  { %727 = vbcast.lane.b32.xlu1 %v717_v35, 272  ;;  %735 = vbcast.lane.b32.xlu0 %v717_v35, 288 }
 0x2b7   :  { %731 = vbcast.lane.b32.xlu1 %v717_v35, 280  ;;  %743 = vbcast.lane.b32.xlu0 %v717_v35, 304 }
 0x2bb   :  { %739 = vbcast.lane.b32.xlu1 %v717_v35, 296  ;;  %754 = vbcast.lane.b32.xlu0 %v752_v38, 256 }
 0x2bf   :  { %747 = vbcast.lane.b32.xlu1 %v717_v35, 312  ;;  %762 = vbcast.lane.b32.xlu0 %v752_v38, 272 }
 0x2c3   :  { %758 = vbcast.lane.b32.xlu1 %v752_v38, 264  ;;  %770 = vbcast.lane.b32.xlu0 %v752_v38, 288 }
 0x2c7   :  { %766 = vbcast.lane.b32.xlu1 %v752_v38, 280  ;;  %778 = vbcast.lane.b32.xlu0 %v752_v38, 304 }
 0x2cb   :  { %774 = vbcast.lane.b32.xlu1 %v752_v38, 296 }
 0x2cf   :  { %782 = vbcast.lane.b32.xlu1 %v752_v38, 312 }
 0x321   :  { %v724_v47 = vpop.permute.xlu1 %723  ;;  %v720_v36 = vpop.permute.xlu0 %719 }
 0x322   :  { %v786_v39 = vmul.f32 %v724_v47, %v1098_v8  ;;  %v787_v53 = vmul.f32 %v724_v47, %v1100_v9  ;;  %v784_v61 = vmul.f32 %v720_v36, %v1086_v2  ;;  %v785_v54 = vmul.f32 %v720_v36, %v1090_v4 }
 0x324   :  { %818 = vst [vmem:[#allocation5 + $0x10] sm:$0xff] %v786_v39  ;;  %819 = vst [vmem:[#allocation5 + $0x18] sm:$0xff] %v787_v53 }
 0x325   :  { %816 = vst [vmem:[#allocation5] sm:$0xff] %v784_v61  ;;  %817 = vst [vmem:[#allocation5 + $0x8] sm:$0xff] %v785_v54  ;;  %v728_v29 = vpop.permute.xlu1 %727  ;;  %v736_v49 = vpop.permute.xlu0 %735 }
 0x326   :  { %v788_v55 = vmul.f32 %v728_v29, %v1110_v14  ;;  %v789_v57 = vmul.f32 %v728_v29, %v1112_v15  ;;  %v792_v59 = vmul.f32 %v736_v49, %v1134_v26  ;;  %v793_v8 = vmul.f32 %v736_v49, %v1136_v27 }
 0x328   :  { %820 = vst [vmem:[#allocation5 + $0x20] sm:$0xff] %v788_v55  ;;  %821 = vst [vmem:[#allocation5 + $0x28] sm:$0xff] %v789_v57 }
 0x329   :  { %824 = vst [vmem:[#allocation5 + $0x40] sm:$0xff] %v792_v59  ;;  %825 = vst [vmem:[#allocation5 + $0x48] sm:$0xff] %v793_v8  ;;  %v732_v2 = vpop.permute.xlu1 %731  ;;  %v744_v4 = vpop.permute.xlu0 %743 }
 0x32a   :  { %v790_v9 = vmul.f32 %v732_v2, %v1122_v20  ;;  %v791_v40 = vmul.f32 %v732_v2, %v1124_v21  ;;  %v796_v37 = vmul.f32 %v744_v4, %v1166_v42  ;;  %v797_v14 = vmul.f32 %v744_v4, %v1168_v43 }
 0x32c   :  { %822 = vst [vmem:[#allocation5 + $0x30] sm:$0xff] %v790_v9  ;;  %823 = vst [vmem:[#allocation5 + $0x38] sm:$0xff] %v791_v40 }
 0x32d   :  { %828 = vst [vmem:[#allocation5 + $0x60] sm:$0xff] %v796_v37  ;;  %829 = vst [vmem:[#allocation5 + $0x68] sm:$0xff] %v797_v14  ;;  %v740_v15 = vpop.permute.xlu1 %739  ;;  %v755_v26 = vpop.permute.xlu0 %754 }
 0x32e   :  { %v794_v27 = vmul.f32 %v740_v15, %v1146_v32  ;;  %v795_v58 = vmul.f32 %v740_v15, %v1148_v33  ;;  %v800_v48 = vmul.f32 %v755_v26, %v1082_v0  ;;  %v801_v20 = vmul.f32 %v755_v26, %v1084_v1 }
 0x330   :  { %826 = vst [vmem:[#allocation5 + $0x50] sm:$0xff] %v794_v27  ;;  %827 = vst [vmem:[#allocation5 + $0x58] sm:$0xff] %v795_v58 }
 0x331   :  { %832 = vst [vmem:[#allocation5 + $0x80] sm:$0xff] %v800_v48  ;;  %833 = vst [vmem:[#allocation5 + $0x88] sm:$0xff] %v801_v20  ;;  %v748_v21 = vpop.permute.xlu1 %747  ;;  %v763_v42 = vpop.permute.xlu0 %762 }
 0x332   :  { %v798_v43 = vmul.f32 %v748_v21, %v1182_v50  ;;  %v799_v30 = vmul.f32 %v748_v21, %v1184_v51  ;;  %v804_v34 = vmul.f32 %v763_v42, %v1106_v12  ;;  %v805_v32 = vmul.f32 %v763_v42, %v1108_v13  ;;  %v1438_v51 = vld [vmem:[#allocation8_spill] sm:$0xff] }
 0x334   :  { %830 = vst [vmem:[#allocation5 + $0x70] sm:$0xff] %v798_v43  ;;  %831 = vst [vmem:[#allocation5 + $0x78] sm:$0xff] %v799_v30 }
 0x335   :  { %836 = vst [vmem:[#allocation5 + $0xa0] sm:$0xff] %v804_v34  ;;  %837 = vst [vmem:[#allocation5 + $0xa8] sm:$0xff] %v805_v32  ;;  %v759_v0 = vpop.permute.xlu1 %758  ;;  %v771_v1 = vpop.permute.xlu0 %770 }
 0x336   :  { %v802_v33 = vmul.f32 %v759_v0, %v1092_v5  ;;  %v803_v56 = vmul.f32 %v759_v0, %v1094_v6  ;;  %v808_v41 = vmul.f32 %v771_v1, %v1130_v24  ;;  %v809_v50 = vmul.f32 %v771_v1, %v1437_v63  ;;  %v1442_v24 = vld [vmem:[#allocation11_spill] sm:$0xff] }
 0x338   :  { %834 = vst [vmem:[#allocation5 + $0x90] sm:$0xff] %v802_v33  ;;  %835 = vst [vmem:[#allocation5 + $0x98] sm:$0xff] %v803_v56 }
 0x339   :  { %840 = vst [vmem:[#allocation5 + $0xc0] sm:$0xff] %v808_v41  ;;  %841 = vst [vmem:[#allocation5 + $0xc8] sm:$0xff] %v809_v50  ;;  %v767_v12 = vpop.permute.xlu1 %766  ;;  %v779_v13 = vpop.permute.xlu0 %778 }
 0x33a   :  { %v806_v3 = vmul.f32 %v767_v12, %v1438_v51  ;;  %v807_v7 = vmul.f32 %v767_v12, %v1439_v44  ;;  %v812_v10 = vmul.f32 %v779_v13, %v1440_v31  ;;  %v813_v5 = vmul.f32 %v779_v13, %v1441_v45 }
 0x33c   :  { %838 = vst [vmem:[#allocation5 + $0xb0] sm:$0xff] %v806_v3  ;;  %839 = vst [vmem:[#allocation5 + $0xb8] sm:$0xff] %v807_v7 }
 0x33d   :  { %844 = vst [vmem:[#allocation5 + $0xe0] sm:$0xff] %v812_v10  ;;  %845 = vst [vmem:[#allocation5 + $0xe8] sm:$0xff] %v813_v5  ;;  %v775_v6 = vpop.permute.xlu1 %774 }
 0x33e   :  { %v810_v19 = vmul.f32 %v775_v6, %v1442_v24  ;;  %v811_v46 = vmul.f32 %v775_v6, %v1443_v16 }
 0x340   :  { %842 = vst [vmem:[#allocation5 + $0xd0] sm:$0xff] %v810_v19  ;;  %843 = vst [vmem:[#allocation5 + $0xd8] sm:$0xff] %v811_v46 }
 0x341   :  { %v783_v22 = vpop.permute.xlu1 %782 }
 0x342   :  { %v814_v60 = vmul.f32 %v783_v22, %v1444_v11  ;;  %v815_v62 = vmul.f32 %v783_v22, %v1445_v23 }
 0x344   :  { %846 = vst [vmem:[#allocation5 + $0xf0] sm:$0xff] %v814_v60  ;;  %847 = vst [vmem:[#allocation5 + $0xf8] sm:$0xff] %v815_v62 }
 0x345   :  { %1015 = shalt.err (!%p1012_p12)
}
 0x346   :  { %s1016_s6 = scalar_lea.hbm %s1415_s5, 4096 }
 0x347   :  { %p1017_p13 = scmp.ne.s32.totalorder %s1415_s5, %s1016_s6  ;;  %p1020_p0 = scmp.lt.u32.totalorder %s1016_s6, %s1415_s5 }
 0x349   :  { %p1022_p1 = pnand %p1020_p0, %p1017_p13 }
 0x34b   :  { %1025 = shalt.err (!%p1022_p1)
}
 0x34c   :  { %859 = dma.vmem_to_hbm [thread:$0]  %s854_s4, 4096, %s1415_s5, [#allocation4], %s1031_s28, %s1031_s28, %s1032_s29  }
 0x34d   :  { %1028 = dma.done.wait [#allocation4], 4096  }
 0x34e   :  { %1029 = vsyncadd [#allocation4], 4294963200 }
 0x34f   :  { %863 = vsyncpa [#allocation3], 1 }
 0x350   :  { %864 = vsyncpa [#allocation4], 1 }

</bundles_post_ra>
